<compile_context>
chip_gen: v6e
topology: v6e:2x2x1
jax: 0.10.0
libtpu: 0.0.40
codegen_flags: <defaults>
</compile_context>

<pallas_src>
import functools

import jax
import jax.numpy as jnp
from jax import lax
from jax.experimental import pallas as pl
from jax.experimental.pallas import tpu as pltpu


_MAX_CLASS_CHUNK = 4096   # classes per inner chunk (multiple of 128)
_MAX_TILE_ROWS = 1024     # row-tile cap (>=512 rows ~ HBM roofline; bounds live vregs)


def _round_up(x: int, m: int) -> int:
    return (x + m - 1) // m * m


def _vmem_capacity_bytes() -> int:
    try:
        return int(pltpu.get_tpu_info().vmem_capacity_bytes)
    except Exception:
        return 64 * 1024 * 1024   # conservative fallback (v7x per-TC)


def _plan(n: int, c: int, in_itemsize: int, row_tile=None, class_chunk=None):
    """Pick (tile_n, c_chunk, num_chunks, num_row_tiles, n_par, n_inner, vmem_limit)."""
    # --- class chunking for vocab-scale C (chunk must be a multiple of 128) ---
    if class_chunk is not None:
        c_chunk = min(int(class_chunk), c)
    elif c <= _MAX_CLASS_CHUNK:
        c_chunk = c
    else:
        c_chunk = _MAX_CLASS_CHUNK
    num_chunks = pl.cdiv(c, c_chunk)

    # --- explicit VMEM limit + budget that counts the f32 working set ---
    vmem_capacity = _vmem_capacity_bytes()
    vmem_limit = int(min(vmem_capacity // 2, 64 * 1024 * 1024))  # 64MiB v5e/v6e, 32MiB v7x
    budget = vmem_limit // 2   # headroom: out block, row scratch, Mosaic internals
    per_row_bytes = (2 * (c_chunk * in_itemsize + 4)   # double-buffered logits + targets
                     + 2 * c_chunk * 4                 # f32 (x - m) copy + exp temporary
                     + 16)                             # m / l / picked row scratch
    tile = budget // max(per_row_bytes, 1)

    # --- dtype-native sublane alignment: 8 (f32) / 16 (bf16,f16) / 32 (int8,fp8) ---
    align = max(8, 32 // max(in_itemsize, 1))
    tile = (tile // align) * align
    tile = min(tile, _MAX_TILE_ROWS)
    tile = min(tile, _round_up(n, align))                    # never larger than the batch
    tile = min(tile, _round_up(pl.cdiv(n, 2), align))        # >=2 row tiles -> 2 v7x TCs busy
    tile = max(tile, align)
    if row_tile is not None:                                  # test/tuning override
        tile = max(align, (int(row_tile) // align) * align)

    num_row_tiles = pl.cdiv(n, tile)
    n_par = 2 if num_row_tiles >= 2 else 1
    n_inner = pl.cdiv(num_row_tiles, n_par)
    return tile, c_chunk, num_chunks, num_row_tiles, n_par, n_inner, vmem_limit


def _ce_kernel(logits_ref, targets_ref, out_ref, m_sc, l_sc, pick_sc, *,
               n_total, c_total, num_chunks, n_inner):
    # logits_ref : (tile_n, c_chunk) native dtype
    # targets_ref: (tile_n, 1) int32
    # out_ref    : (1, 8, 128) f32 accumulator, resident per parallel group
    p = pl.program_id(0)   # parallel row-tile group (megacore)
    i = pl.program_id(1)   # row tile within group
    k = pl.program_id(2)   # class chunk
    tile_n, c_chunk = logits_ref.shape

    # Zero the per-group accumulator on its first visit.
    @pl.when(jnp.logical_and(i == 0, k == 0))
    def _():
        out_ref[...] = jnp.zeros_like(out_ref)

    x = logits_ref[...]                          # stay in native dtype (bf16-friendly)
    tgt = targets_ref[...]                       # (tile_n, 1) int32
    col = lax.broadcasted_iota(jnp.int32, (tile_n, c_chunk), 1)
    hit = col == (tgt - k * c_chunk)             # at most one hit per row
    # TODO(synk): pl.debug_check for out-of-range targets (torch raises; here GIGO).

    def _accumulate_loss(per_row):
        # Mask padding rows of partial / duplicated row tiles (select blocks NaN leaks).
        row0 = (p * n_inner + i) * tile_n
        rows = row0 + lax.broadcasted_iota(jnp.int32, per_row.shape, 0)
        per_row = jnp.where(rows < n_total, per_row, 0.0)
        out_ref[...] += jnp.sum(per_row)

    if num_chunks == 1:
        # Single fused pass: max / pick in native dtype, one f32 (x - m) temp reused.
        m = jnp.max(x, axis=-1, keepdims=True).astype(jnp.float32)
        xm = x.astype(jnp.float32) - m
        ssum = jnp.sum(jnp.exp(xm), axis=-1, keepdims=True)
        picked_m = jnp.sum(jnp.where(hit, xm, 0.0), axis=-1, keepdims=True)
        _accumulate_loss(jnp.log(ssum) - picked_m)      # == m + log(sum) - x[y]
    else:
        # Online (flash-style) logsumexp across class chunks.
        @pl.when(k == 0)
        def _():
            m_sc[...] = jnp.full_like(m_sc, -jnp.inf)
            l_sc[...] = jnp.zeros_like(l_sc)
            pick_sc[...] = jnp.zeros_like(pick_sc)

        if c_total % c_chunk != 0:
            # Last chunk is partial: mask out-of-range class columns.
            x = jnp.where(col < (c_total - k * c_chunk), x, -jnp.inf)

        chunk_max = jnp.max(x, axis=-1, keepdims=True).astype(jnp.float32)
        m_old = m_sc[...]
        m_new = jnp.maximum(m_old, chunk_max)
        xm = x.astype(jnp.float32) - m_new
        l_sc[...] = l_sc[...] * jnp.exp(m_old - m_new) + jnp.sum(
            jnp.exp(xm), axis=-1, keepdims=True)
        m_sc[...] = m_new
        # Raw picked logit (exactly one nonzero -> exact even in bf16).
        pick_sc[...] += jnp.sum(jnp.where(hit, x, jnp.zeros_like(x)),
                                axis=-1, keepdims=True).astype(jnp.float32)

        @pl.when(k == num_chunks - 1)
        def _():
            _accumulate_loss(m_sc[...] + jnp.log(l_sc[...]) - pick_sc[...])


def cross_entropy_loss(y_hat: jax.Array, y: jax.Array, *,
                       row_tile=None, class_chunk=None) -> jax.Array:
    """Pallas equivalent of nn.CrossEntropyLoss()(y_hat, y) (defaults: mean reduction)."""
    if y_hat.ndim > 2:
        # torch layout (N, C, d1, ...): move classes last and flatten the rest.
        c_dim = y_hat.shape[1]
        y_hat = jnp.moveaxis(y_hat, 1, -1).reshape(-1, c_dim)
        y = y.reshape(-1)

    n, c = y_hat.shape
    targets = y.astype(jnp.int32).reshape(n, 1)
    itemsize = jnp.dtype(y_hat.dtype).itemsize

    (tile_n, c_chunk, num_chunks, num_row_tiles,
     n_par, n_inner, vmem_limit) = _plan(n, c, itemsize, row_tile, class_chunk)

    kernel = functools.partial(_ce_kernel, n_total=n, c_total=c,
                               num_chunks=num_chunks, n_inner=n_inner)

    def logits_map(p, i, k):
        # Clamp duplicate trailing slots (odd tile count split over 2 groups) to a
        # valid tile; their rows are masked out in-kernel via the row mask.
        return (jnp.minimum(p * n_inner + i, num_row_tiles - 1), k)

    def targets_map(p, i, k):
        return (jnp.minimum(p * n_inner + i, num_row_tiles - 1), 0)

    cost = pl.CostEstimate(
        flops=6 * n * c,
        transcendentals=n * c,
        bytes_accessed=n * c * itemsize + n * 4 + n_par * 8 * 128 * 4,
    )

    # TODO(synk): for C < 128 fold rows into lanes ((N,C) -> (N/g, g*C), g=128//C)
    #             with segmented in-kernel reductions to keep vregs lane-dense.
    # TODO(synk): sweep pipeline_mode=pl.Buffered(3) on the logits spec for the
    #             large-C / small-tile regime.
    partial_sums = pl.pallas_call(
        kernel,
        out_shape=jax.ShapeDtypeStruct((n_par, 8, 128), jnp.float32),
        grid_spec=pltpu.PrefetchScalarGridSpec(
            num_scalar_prefetch=0,
            grid=(n_par, n_inner, num_chunks),
            in_specs=[
                pl.BlockSpec((tile_n, c_chunk), logits_map),
                pl.BlockSpec((tile_n, 1), targets_map),
            ],
            out_specs=pl.BlockSpec((1, 8, 128), lambda p, i, k: (p, 0, 0)),
            scratch_shapes=[
                pltpu.VMEM((tile_n, 1), jnp.float32),   # running max
                pltpu.VMEM((tile_n, 1), jnp.float32),   # running exp-sum
                pltpu.VMEM((tile_n, 1), jnp.float32),   # picked logit
            ],
        ),
        compiler_params=pltpu.CompilerParams(
            dimension_semantics=("parallel", "arbitrary", "arbitrary"),
            vmem_limit_bytes=vmem_limit,
        ),
        cost_estimate=cost,
    )(y_hat, targets)

    # TODO(synk): torch CrossEntropyLoss optional weight / ignore_index / label_smoothing
    #             are not mirrored (the reference module uses the defaults).
    return jnp.sum(partial_sums[:, 0, 0]) / jnp.float32(n)


class CrossEntropyPallas:
    """Mirror of the PyTorch Cross_entropy module (cfg unused in forward)."""

    def __init__(self, cfg=None):
        self.cfg = cfg  # kept for parity; no parameters to initialize

    def __call__(self, pred_dict, gt_dict):
        return cross_entropy_loss(pred_dict["y_hat"], gt_dict["y"])


if __name__ == "__main__":
    key = jax.random.PRNGKey(0)
    k1, k2, k3, k4, k5, k6 = jax.random.split(key, 6)

    def _ref(logits, labels):
        lg = logits.astype(jnp.float32)
        picked = jnp.take_along_axis(lg, labels.astype(jnp.int32)[:, None], axis=-1)[:, 0]
        return jnp.mean(jax.nn.logsumexp(lg, axis=-1) - picked)

    module = CrossEntropyPallas(cfg=None)

    # 1) small f32 case through the module interface (batch=8, classes=32)
    N, C = 8, 32
    y_hat = jax.random.normal(k1, (N, C), dtype=jnp.float32)
    y = jax.random.randint(k2, (N,), 0, C, dtype=jnp.int32)
    loss = jax.block_until_ready(module({"y_hat": y_hat}, {"y": y}))
    assert jnp.allclose(loss, _ref(y_hat, y), atol=1e-5, rtol=1e-5), (loss, _ref(y_hat, y))

    # 2) bf16 logits, batch not a multiple of the row tile (partial-tile masking)
    N, C = 37, 160
    y_hat = (jax.random.normal(k3, (N, C), dtype=jnp.float32) * 3.0).astype(jnp.bfloat16)
    y = jax.random.randint(k4, (N,), 0, C, dtype=jnp.int32)
    loss = jax.block_until_ready(cross_entropy_loss(y_hat, y))
    assert jnp.allclose(loss, _ref(y_hat, y), atol=1e-3, rtol=1e-3), (loss, _ref(y_hat, y))

    # 3) forced class-chunking + odd tile count (online-softmax, partial class chunk,
    #    duplicate-slot clamp paths)
    N, C = 40, 320
    y_hat = jax.random.normal(k5, (N, C), dtype=jnp.float32)
    y = jax.random.randint(k6, (N,), 0, C, dtype=jnp.int32)
    loss = jax.block_until_ready(cross_entropy_loss(y_hat, y, row_tile=16, class_chunk=128))
    assert jnp.allclose(loss, _ref(y_hat, y), atol=1e-4, rtol=1e-5), (loss, _ref(y_hat, y))

    print("KERNEL_OK")
</pallas_src>

<mosaic_0001>
module attributes {stable_mosaic.version = 11 : i64} {
  func.func @_ce_kernel(%arg0: i32, %arg1: i32, %arg2: i32, %arg3: memref<8x32xf32, #tpu.memory_space<vmem>>, %arg4: memref<8x1xi32, #tpu.memory_space<vmem>>, %arg5: memref<1x8x128xf32, #tpu.memory_space<vmem>>, %arg6: memref<8x1xf32, #tpu.memory_space<vmem>>, %arg7: memref<8x1xf32, #tpu.memory_space<vmem>>, %arg8: memref<8x1xf32, #tpu.memory_space<vmem>>) attributes {dimension_semantics = [#tpu.dimension_semantics<parallel>, #tpu.dimension_semantics<arbitrary>, #tpu.dimension_semantics<arbitrary>], iteration_bounds = array<i64: 1, 1, 1>, scalar_prefetch = 0 : i64, scratch_operands = 3 : i64, tpu.core_type = #tpu.core_type<tc>, window_params = [{transform_indices = @transform_0, window_bounds = array<i64: 8, 32>}, {transform_indices = @transform_1, window_bounds = array<i64: 8, 1>}, {transform_indices = @transform_2, window_bounds = array<i64: 1, 8, 128>}]} {
    %c0_i32 = arith.constant 0 : i32
    %0 = arith.cmpi eq, %arg1, %c0_i32 : i32
    %c0_i32_0 = arith.constant 0 : i32
    %1 = arith.cmpi eq, %arg2, %c0_i32_0 : i32
    %2 = arith.andi %0, %1 : i1
    %3 = arith.extui %2 : i1 to i32
    %c0_i32_1 = arith.constant 0 : i32
    %4 = arith.cmpi ne, %3, %c0_i32_1 : i32
    scf.if %4 {
      %cst_17 = arith.constant 0.000000e+00 : f32
      %44 = vector.broadcast %cst_17 : f32 to vector<1x8x128xf32>
      %c0_18 = arith.constant 0 : index
      %c0_19 = arith.constant 0 : index
      %c0_20 = arith.constant 0 : index
      %45 = vector.load %arg5[%c0_18, %c0_19, %c0_20] : memref<1x8x128xf32, #tpu.memory_space<vmem>>, vector<1x8x128xf32>
      tpu.vector_store %arg5[%c0_18, %c0_19, %c0_20], %44 {strides = array<i32>} : memref<1x8x128xf32, #tpu.memory_space<vmem>>, vector<1x8x128xf32>,
    } else {
    }
    %c0 = arith.constant 0 : index
    %c0_2 = arith.constant 0 : index
    %5 = vector.load %arg3[%c0, %c0_2] : memref<8x32xf32, #tpu.memory_space<vmem>>, vector<8x32xf32>
    %c0_3 = arith.constant 0 : index
    %c0_4 = arith.constant 0 : index
    %6 = vector.load %arg4[%c0_3, %c0_4] : memref<8x1xi32, #tpu.memory_space<vmem>>, vector<8x1xi32>
    %7 = tpu.iota {dimensions = array<i32: 1>} : vector<8x32xi32>
    %c32_i32 = arith.constant 32 : i32
    %8 = arith.muli %arg2, %c32_i32 : i32
    %9 = vector.broadcast %8 : i32 to vector<8x1xi32>
    %10 = arith.subi %6, %9 : vector<8x1xi32>
    %11 = vector.broadcast %10 : vector<8x1xi32> to vector<8x32xi32>
    %12 = arith.cmpi eq, %7, %11 : vector<8x32xi32>
    %cst = arith.constant dense<0xFF800000> : vector<8xf32>
    %13 = vector.multi_reduction <maximumf>, %5, %cst [1] : vector<8x32xf32> to vector<8xf32>
    %14 = vector.shape_cast %13 : vector<8xf32> to vector<8x1xf32>
    %15 = vector.broadcast %14 : vector<8x1xf32> to vector<8x32xf32>
    %16 = arith.subf %5, %15 : vector<8x32xf32>
    %17 = math.exp %16 : vector<8x32xf32>
    %cst_5 = arith.constant dense<0.000000e+00> : vector<8xf32>
    %18 = vector.multi_reduction <add>, %17, %cst_5 [1] : vector<8x32xf32> to vector<8xf32>
    %19 = vector.shape_cast %18 : vector<8xf32> to vector<8x1xf32>
    %cst_6 = arith.constant 0.000000e+00 : f32
    %20 = vector.broadcast %cst_6 : f32 to vector<8x32xf32>
    %21 = arith.select %12, %16, %20 : vector<8x32xi1>, vector<8x32xf32>
    %cst_7 = arith.constant dense<0.000000e+00> : vector<8xf32>
    %22 = vector.multi_reduction <add>, %21, %cst_7 [1] : vector<8x32xf32> to vector<8xf32>
    %23 = vector.shape_cast %22 : vector<8xf32> to vector<8x1xf32>
    %24 = math.log %19 : vector<8x1xf32>
    %25 = arith.subf %24, %23 : vector<8x1xf32>
    %c1_i32 = arith.constant 1 : i32
    %26 = arith.muli %arg0, %c1_i32 : i32
    %27 = arith.addi %26, %arg1 : i32
    %c8_i32 = arith.constant 8 : i32
    %28 = arith.muli %27, %c8_i32 : i32
    %29 = tpu.iota {dimensions = array<i32: 0>} : vector<8x1xi32>
    %30 = vector.broadcast %28 : i32 to vector<8x1xi32>
    %31 = arith.addi %30, %29 : vector<8x1xi32>
    %c8_i32_8 = arith.constant 8 : i32
    %32 = vector.broadcast %c8_i32_8 : i32 to vector<8x1xi32>
    %33 = arith.cmpi slt, %31, %32 : vector<8x1xi32>
    %cst_9 = arith.constant 0.000000e+00 : f32
    %34 = vector.broadcast %cst_9 : f32 to vector<8x1xf32>
    %35 = arith.select %33, %25, %34 : vector<8x1xi1>, vector<8x1xf32>
    %c0_10 = arith.constant 0 : index
    %c0_11 = arith.constant 0 : index
    %c0_12 = arith.constant 0 : index
    %36 = vector.load %arg5[%c0_10, %c0_11, %c0_12] : memref<1x8x128xf32, #tpu.memory_space<vmem>>, vector<1x8x128xf32>
    %37 = vector.shape_cast %35 : vector<8x1xf32> to vector<1x8x1xf32>
    %cst_13 = arith.constant dense<0.000000e+00> : vector<1xf32>
    %38 = vector.multi_reduction <add>, %37, %cst_13 [1, 2] : vector<1x8x1xf32> to vector<1xf32>
    %39 = vector.shape_cast %38 : vector<1xf32> to vector<1x1x1xf32>
    %40 = vector.extract %39[0, 0, 0] : f32 from vector<1x1x1xf32>
    %41 = vector.broadcast %40 : f32 to vector<1x8x128xf32>
    %42 = arith.addf %36, %41 : vector<1x8x128xf32>
    %c0_14 = arith.constant 0 : index
    %c0_15 = arith.constant 0 : index
    %c0_16 = arith.constant 0 : index
    %43 = vector.load %arg5[%c0_14, %c0_15, %c0_16] : memref<1x8x128xf32, #tpu.memory_space<vmem>>, vector<1x8x128xf32>
    tpu.vector_store %arg5[%c0_14, %c0_15, %c0_16], %42 {strides = array<i32>} : memref<1x8x128xf32, #tpu.memory_space<vmem>>, vector<1x8x128xf32>,
    return
  }
  func.func @transform_0(%arg0: i32, %arg1: i32, %arg2: i32) -> (i32, i32) {
    %c1_i32 = arith.constant 1 : i32
    %0 = arith.muli %arg0, %c1_i32 : i32
    %1 = arith.addi %0, %arg1 : i32
    %c0_i32 = arith.constant 0 : i32
    %2 = arith.minsi %1, %c0_i32 : i32
    %c0_i32_0 = arith.constant 0 : i32
    return %2, %arg2 : i32, i32
  }
  func.func @transform_1(%arg0: i32, %arg1: i32, %arg2: i32) -> (i32, i32) {
    %c1_i32 = arith.constant 1 : i32
    %0 = arith.muli %arg0, %c1_i32 : i32
    %1 = arith.addi %0, %arg1 : i32
    %c0_i32 = arith.constant 0 : i32
    %2 = arith.minsi %1, %c0_i32 : i32
    %c0_i32_0 = arith.constant 0 : i32
    %c0_i32_1 = arith.constant 0 : i32
    return %2, %c0_i32_0 : i32, i32
  }
  func.func @transform_2(%arg0: i32, %arg1: i32, %arg2: i32) -> (i32, i32, i32) {
    %c0_i32 = arith.constant 0 : i32
    %c0_i32_0 = arith.constant 0 : i32
    %c0_i32_1 = arith.constant 0 : i32
    return %arg0, %c0_i32, %c0_i32_0 : i32, i32, i32
  }
}

</mosaic_0001>

<bundles_post_ra>
// kernel: tpu_custom_call.1
= control target key start
LH: loop header
LB: loop body
LE: loop exit
PB: predicated region body
PF: predicated region fallthrough
CT: control target
= control target key end

     0   :  { %vm84_vm0 = vcmask 261120   ;;  %s211_s0 = inlined_call_operand.vmem [shape: f32[8,32], index: 0, kind: input, shape index: {}]   ;;  %s212_s1 = inlined_call_operand.vmem [shape: s32[8,1], index: 1, kind: input, shape index: {}]   ;;  %s213_s2 = inlined_call_operand.hbm [shape: f32[1,8,128], index: 2, kind: output, shape index: {}]  }
   0x1   :  { %v73_v0 = vld [vmem:[%s211_s0] sm:$0xff] }
   0x2   :  { %7 = vsyncpa [#allocation6], 0  ;;  %v85_v1 = vsel %vm84_vm0, %v73_v0, -inf  ;;  %v182_v2 = vmov 0   ;;  %v74_v3 = vld [vmem:[%s212_s1] sm:$0xff]  ;;  %v75_v7 = vlaneseq  ;;  %vm110_vm2 = vcmask 7168  }
   0x3   :  { %155 = vset.pattern.permute.xlu0 %v182_v2  ;;  %s183_s0 = smov [#allocation5]  }
   0x4   :  { %86 = vmax.xlane.f32.xlu0 %v85_v1  ;;  %v76_v8 = vand.u32 127, %v75_v7  ;;  %s130_s1 = sshll.u32 %s183_s0, 4  ;;  %s131_s1 = int_to_ptr.vmem [resolvable:$true] %s130_s1 }
   0x5   :  { %s160_s14 = scalar_lea.vmem %s131_s1, 128  ;;  %p165_p1 = scmp.lt.s32.totalorder %s131_s1, %s131_s1 }
   0x6   :  { %p161_p0 = scmp.ne.s32.totalorder %s131_s1, %s160_s14  ;;  %p166_p2 = scmp.lt.s32.totalorder %s160_s14, %s160_s14 }
   0x8   :  { %p167_p3 = por %p166_p2, %p165_p1 }
   0xa   :  { %p168_p4 = pnand %p167_p3, %p161_p0 }
  0x1a   :  { %81 = vperm.xlu0 %155, %v74_v3  }
  0x8d   :  { %v87_v4 = vpop.xlane.xlu0 %86 }
  0x8e   :  { %v88_v5 = vsub.f32 %v73_v0, %v87_v4 }
  0x90   :  { %v89_v6 = vmul.f32 1.442695, %v88_v5 }
  0x92   :  { %156 = vpow2.f32 %v89_v6 }
  0x95   :  { %v82_v9 = vpop.permute.xlu0 %81 }
  0x96   :  { %vm83_vm1 = vcmp.eq.s32.totalorder %v76_v8, %v82_v9 }
  0x97   :  { %v94_v12 = vsel %vm83_vm1, %v88_v5, 0.0 }
  0x98   :  { %v95_v13 = vsel %vm84_vm0, %v94_v12, 0.0 }
  0x9f   :  { %v157_v10 = vpop.eup %156 }
  0xa0   :  { %v91_v11 = vsel %vm84_vm0, %v157_v10, 0.0 }
  0xa1   :  { %92 = vadd.xlane.f32.xlu1 %v91_v11 }
  0xa5   :  { %96 = vadd.xlane.f32.xlu1 %v95_v13 }
 0x12a   :  { %v93_v14 = vpop.xlane.xlu1 %92 }
 0x12b   :  { %158 = vlog2.f32 %v93_v14 }
 0x12e   :  { %v97_v17 = vpop.xlane.xlu1 %96 }
 0x138   :  { %v159_v15 = vpop.eup %158 }
 0x139   :  { %v99_v16 = vmul.f32 0.6931472, %v159_v15 }
 0x13b   :  { %v100_v18 = vsub.f32 %v99_v16, %v97_v17 }
 0x13d   :  { %v111_v19 = vsel %vm110_vm2, %v100_v18, 0.0 }
 0x13e   :  { %112 = vadd.xlane.f32.xlu1 %v111_v19 }
 0x1c7   :  { %v113_v20 = vpop.xlane.xlu1 %112 }
 0x1c8   :  { %v114_v21 = vrot.slane %v113_v20, 4 }
 0x1ca   :  { %v115_v22 = vadd.f32 %v114_v21, %v113_v20 }
 0x1cc   :  { %v116_v23 = vrot.slane %v115_v22, 2 }
 0x1ce   :  { %v117_v24 = vadd.f32 %v116_v23, %v115_v22 }
 0x1d0   :  { %v118_v25 = vrot.slane %v117_v24, 1 }
 0x1d2   :  { %v119_v26 = vadd.f32 %v118_v25, %v117_v24 }
 0x1d4   :  { %150 = vpush %v119_v26 }
 0x205   :  { %s151_s13 = spop %150 }
 0x206   :  { %v121_v27 = vstv %s151_s13 }
 0x207   :  { %123 = vst [vmem:[#allocation5] sm:$0xff] %v121_v27 }
 0x208   :  { %171 = shalt.err (!%p168_p4)
}
 0x209   :  { %133 = dma.vmem_to_hbm [thread:$0]  %s131_s1, 128, %s213_s2, [#allocation6]  }
 0x20a   :  { %180 = dma.done.wait [#allocation6], 128  }
 0x20b   :  { %181 = vsyncadd [#allocation6], 4294967168 }
 0x20c   :  { %137 = vsyncpa [#allocation6], 1 }

</bundles_post_ra>
